<compile_context>
chip_gen: v5e
topology: v5e:2x2
jax: 0.10.0
libtpu: 0.0.40
codegen_flags: <defaults>
</compile_context>

<pallas_src>
import functools

import jax
import jax.numpy as jnp
from jax import lax
from jax.experimental import pallas as pl
from jax.experimental.pallas import tpu as pltpu


def _cosface_kernel(emb_ref, w_ref, inv_wn_ref, lab_ref, out_ref, *, s, m):
    # emb_ref:    (TB, D)  f32
    # w_ref:      (D, TC)  bf16 (pre-cast in wrapper)
    # inv_wn_ref: (1, TC)  f32  (precomputed 1/||w_col||)
    # lab_ref:    (TB, 1)  int32
    # out_ref:    (TB, TC) f32
    j = pl.program_id(0)  # class-tile index (outer grid axis)

    emb = emb_ref[...]                              # (TB, D) f32
    lab = lab_ref[...]                              # (TB, 1) int32
    inv_wn = inv_wn_ref[...]                        # (1, TC) f32

    # Row-wise inverse L2 norm of the embeddings (rsqrt -> EUP slot).
    inv_en = lax.rsqrt(jnp.sum(emb * emb, axis=1, keepdims=True))  # (TB, 1)

    # Raw (un-normalized) matmul on the MXU with bf16 operands, f32 accum.
    raw = jnp.dot(emb.astype(jnp.bfloat16), w_ref[...],
                  preferred_element_type=jnp.float32)              # (TB, TC)

    # Fold both normalizations in after the matmul (algebraically identical).
    cos = raw * inv_en * inv_wn
    cos = jnp.clip(cos, -1.0, 1.0)

    tb, tc = cos.shape
    # Global column indices of this tile; subtract margin m at the label
    # column for rows whose label != -1 (one-hot via iota compare, no scatter).
    col = lax.broadcasted_iota(jnp.int32, (tb, tc), 1) + j * tc
    hit = jnp.logical_and(col == lab, lab != -1)
    cos = cos - m * hit.astype(jnp.float32)

    out_ref[...] = (cos * s).astype(out_ref.dtype)


def _pick_tile(n, candidates):
    for c in candidates:
        if n % c == 0:
            return c
    return n  # fall back to the full dimension (always layout-legal)


def cosface_cosnorm(embeddings, weight, label, *, s=64.0, m=0.35,
                    tb=None, tc=None):
    """Pallas-backed CosFaceCosNorm forward.

    embeddings: (B, D) float32
    weight:     (D, C) float32 (nn.Parameter, (in_features, out_features))
    label:      (B,)   int32   (-1 => no margin for that row)
    Returns (ret, positive_sims) matching the PyTorch module.
    """
    B, D = embeddings.shape
    D2, C = weight.shape
    assert D == D2

    # Tile selection: lane-dense class tiles, batch tiles multiple of 8 and
    # bounded so the double-buffered working set fits v7x's smaller VMEM.
    if tc is None:
        tc = _pick_tile(C, (512, 256, 128))
    if tb is None:
        tb = B if B <= 256 else _pick_tile(B, (256, 128, 64, 32, 16, 8))
    assert B % tb == 0 and C % tc == 0

    embeddings = embeddings.astype(jnp.float32)
    weight_f32 = weight.astype(jnp.float32)
    # Precompute inverse column norms once (f32), cast weight to bf16 once.
    inv_w_norm = lax.rsqrt(jnp.sum(weight_f32 * weight_f32, axis=0,
                                   keepdims=True))              # (1, C) f32
    weight_bf16 = weight_f32.astype(jnp.bfloat16)               # (D, C) bf16
    lab2d = label.astype(jnp.int32).reshape(B, 1)

    # Explicit VMEM budget: double-buffered inputs + double-buffered output,
    # with 2x headroom, clamped well under v7x's 64 MiB physical VMEM.
    work_bytes = 2 * (tb * D * 4 + D * tc * 2 + tc * 4 + tb * 4) \
        + 2 * tb * tc * 4
    vmem_limit = min(max(2 * work_bytes + (1 << 20), 16 << 20), 48 << 20)

    kernel = functools.partial(_cosface_kernel, s=float(s), m=float(m))
    ret = pl.pallas_call(
        kernel,
        out_shape=jax.ShapeDtypeStruct((B, C), jnp.float32),
        grid_spec=pltpu.PrefetchScalarGridSpec(
            num_scalar_prefetch=0,
            # Class axis outer, batch axis inner: each (D, tc) weight tile is
            # DMA'd from HBM once and reused across every batch tile.
            grid=(C // tc, B // tb),
            in_specs=[
                pl.BlockSpec((tb, D), lambda j, i: (i, 0)),   # embeddings
                pl.BlockSpec((D, tc), lambda j, i: (0, j)),   # weight (bf16)
                pl.BlockSpec((1, tc), lambda j, i: (0, j)),   # 1/||w_col||
                pl.BlockSpec((tb, 1), lambda j, i: (i, 0)),   # labels
            ],
            out_specs=pl.BlockSpec((tb, tc), lambda j, i: (i, j)),
        ),
        compiler_params=pltpu.CompilerParams(
            dimension_semantics=("parallel", "parallel"),
            vmem_limit_bytes=vmem_limit),
    )(embeddings, weight_bf16, inv_w_norm, lab2d)

    # positive_sims = ret[arange(B)[:, None], label.view(-1, 1)].std()
    # torch negative indices wrap (label == -1 -> last column); torch .std()
    # is ddof=1.  Tiny (B,) gather + std stays in JAX glue.
    col = jnp.where(label < 0, label + C, label)
    pos = jnp.take_along_axis(ret, col[:, None].astype(jnp.int32), axis=1)[:, 0]
    positive_sims = jnp.std(pos, ddof=1)
    return ret, positive_sims


def _reference(embeddings, weight, label, *, s=64.0, m=0.35):
    # Pure-JAX f32 reference reproducing the PyTorch forward.
    emb_n = embeddings / jnp.linalg.norm(embeddings, axis=1, keepdims=True)
    w_n = weight / jnp.linalg.norm(weight, axis=0, keepdims=True)
    cos = jnp.clip(emb_n @ w_n, -1.0, 1.0)
    B, C = cos.shape
    onehot = (jnp.arange(C)[None, :] == label[:, None]) & (label[:, None] != -1)
    cos = cos - m * onehot.astype(cos.dtype)
    ret = cos * s
    col = jnp.where(label < 0, label + C, label)
    pos = ret[jnp.arange(B), col]
    return ret, jnp.std(pos, ddof=1)


if __name__ == "__main__":
    B, D, C = 8, 32, 512          # batch, in_features, out_features
    s_val, m_val = 64.0, 0.35

    key = jax.random.PRNGKey(0)
    k_emb, k_w, k_lab = jax.random.split(key, 3)

    embeddings = jax.random.normal(k_emb, (B, D), dtype=jnp.float32)
    # nn.init.normal_(kernel, std=0.01), deterministic synthetic init
    weight = 0.01 * jax.random.normal(k_w, (D, C), dtype=jnp.float32)
    label = jax.random.randint(k_lab, (B,), 0, C, dtype=jnp.int32)
    label = label.at[3].set(-1)   # exercise the "no margin" path

    ret, positive_sims = cosface_cosnorm(
        embeddings, weight, label, s=s_val, m=m_val)
    ret = jax.block_until_ready(ret)
    positive_sims = jax.block_until_ready(positive_sims)

    ret_ref, pos_ref = _reference(embeddings, weight, label, s=s_val, m=m_val)
    # bf16 MXU operands with f32 accumulation -> loosen tolerance vs f32 ref.
    assert jnp.allclose(ret, ret_ref, atol=3e-1, rtol=2e-2), \
        float(jnp.max(jnp.abs(ret - ret_ref)))
    assert jnp.allclose(positive_sims, pos_ref, atol=5e-1, rtol=5e-2), \
        (float(positive_sims), float(pos_ref))

    print("KERNEL_OK")
</pallas_src>

<mosaic_0001>
module attributes {stable_mosaic.version = 11 : i64} {
  func.func @_cosface_kernel(%arg0: i32, %arg1: i32, %arg2: memref<8x32xf32, #tpu.memory_space<vmem>>, %arg3: memref<32x512xbf16, #tpu.memory_space<vmem>>, %arg4: memref<1x512xf32, #tpu.memory_space<vmem>>, %arg5: memref<8x1xi32, #tpu.memory_space<vmem>>, %arg6: memref<8x512xf32, #tpu.memory_space<vmem>>) attributes {dimension_semantics = [#tpu.dimension_semantics<parallel>, #tpu.dimension_semantics<parallel>], iteration_bounds = array<i64: 1, 1>, scalar_prefetch = 0 : i64, scratch_operands = 0 : i64, tpu.core_type = #tpu.core_type<tc>, window_params = [{transform_indices = @transform_0, window_bounds = array<i64: 8, 32>}, {transform_indices = @transform_1, window_bounds = array<i64: 32, 512>}, {transform_indices = @transform_2, window_bounds = array<i64: 1, 512>}, {transform_indices = @transform_3, window_bounds = array<i64: 8, 1>}, {transform_indices = @transform_4, window_bounds = array<i64: 8, 512>}]} {
    %c0 = arith.constant 0 : index
    %c0_0 = arith.constant 0 : index
    %0 = vector.load %arg2[%c0, %c0_0] : memref<8x32xf32, #tpu.memory_space<vmem>>, vector<8x32xf32>
    %c0_1 = arith.constant 0 : index
    %c0_2 = arith.constant 0 : index
    %1 = vector.load %arg5[%c0_1, %c0_2] : memref<8x1xi32, #tpu.memory_space<vmem>>, vector<8x1xi32>
    %c0_3 = arith.constant 0 : index
    %c0_4 = arith.constant 0 : index
    %2 = vector.load %arg4[%c0_3, %c0_4] : memref<1x512xf32, #tpu.memory_space<vmem>>, vector<1x512xf32>
    %3 = arith.mulf %0, %0 : vector<8x32xf32>
    %cst = arith.constant dense<0.000000e+00> : vector<8xf32>
    %4 = vector.multi_reduction <add>, %3, %cst [1] : vector<8x32xf32> to vector<8xf32>
    %5 = vector.shape_cast %4 : vector<8xf32> to vector<8x1xf32>
    %6 = math.rsqrt %5 : vector<8x1xf32>
    %7 = arith.truncf %0 : vector<8x32xf32> to vector<8x32xbf16>
    %c0_5 = arith.constant 0 : index
    %c0_6 = arith.constant 0 : index
    %8 = vector.load %arg3[%c0_5, %c0_6] : memref<32x512xbf16, #tpu.memory_space<vmem>>, vector<32x512xbf16>
    %cst_7 = arith.constant dense<0.000000e+00> : vector<8x512xf32>
    %9 = tpu.matmul %7, %8, %cst_7 {dimension_numbers = #tpu.dot_dimension_numbers<[1], [0], [0], [1], [0, 0, 1, 1], [], []>} : vector<8x32xbf16>, vector<32x512xbf16>, vector<8x512xf32> -> vector<8x512xf32>
    %10 = vector.broadcast %6 : vector<8x1xf32> to vector<8x512xf32>
    %11 = arith.mulf %9, %10 : vector<8x512xf32>
    %12 = vector.broadcast %2 : vector<1x512xf32> to vector<8x512xf32>
    %13 = arith.mulf %11, %12 : vector<8x512xf32>
    %cst_8 = arith.constant -1.000000e+00 : f32
    %cst_9 = arith.constant 1.000000e+00 : f32
    %14 = vector.broadcast %cst_8 : f32 to vector<8x512xf32>
    %15 = arith.maximumf %14, %13 : vector<8x512xf32>
    %16 = vector.broadcast %cst_9 : f32 to vector<8x512xf32>
    %17 = arith.minimumf %16, %15 : vector<8x512xf32>
    %18 = tpu.iota {dimensions = array<i32: 1>} : vector<8x512xi32>
    %c512_i32 = arith.constant 512 : i32
    %19 = arith.muli %arg0, %c512_i32 : i32
    %20 = vector.broadcast %19 : i32 to vector<8x512xi32>
    %21 = arith.addi %18, %20 : vector<8x512xi32>
    %22 = vector.broadcast %1 : vector<8x1xi32> to vector<8x512xi32>
    %23 = arith.cmpi eq, %21, %22 : vector<8x512xi32>
    %c-1_i32 = arith.constant -1 : i32
    %24 = vector.broadcast %c-1_i32 : i32 to vector<8x1xi32>
    %25 = arith.cmpi ne, %1, %24 : vector<8x1xi32>
    %26 = vector.broadcast %25 : vector<8x1xi1> to vector<8x512xi1>
    %27 = arith.andi %23, %26 : vector<8x512xi1>
    %28 = arith.extui %27 : vector<8x512xi1> to vector<8x512xi32>
    %29 = arith.sitofp %28 : vector<8x512xi32> to vector<8x512xf32>
    %cst_10 = arith.constant 3.500000e-01 : f32
    %30 = vector.broadcast %cst_10 : f32 to vector<8x512xf32>
    %31 = arith.mulf %30, %29 : vector<8x512xf32>
    %32 = arith.subf %17, %31 : vector<8x512xf32>
    %cst_11 = arith.constant 6.400000e+01 : f32
    %33 = vector.broadcast %cst_11 : f32 to vector<8x512xf32>
    %34 = arith.mulf %32, %33 : vector<8x512xf32>
    %c0_12 = arith.constant 0 : index
    %c0_13 = arith.constant 0 : index
    %35 = vector.load %arg6[%c0_12, %c0_13] : memref<8x512xf32, #tpu.memory_space<vmem>>, vector<8x512xf32>
    tpu.vector_store %arg6[%c0_12, %c0_13], %34 {strides = array<i32>} : memref<8x512xf32, #tpu.memory_space<vmem>>, vector<8x512xf32>,
    return
  }
  func.func @transform_0(%arg0: i32, %arg1: i32) -> (i32, i32) {
    %c0_i32 = arith.constant 0 : i32
    %c0_i32_0 = arith.constant 0 : i32
    return %arg1, %c0_i32 : i32, i32
  }
  func.func @transform_1(%arg0: i32, %arg1: i32) -> (i32, i32) {
    %c0_i32 = arith.constant 0 : i32
    %c0_i32_0 = arith.constant 0 : i32
    return %c0_i32, %arg0 : i32, i32
  }
  func.func @transform_2(%arg0: i32, %arg1: i32) -> (i32, i32) {
    %c0_i32 = arith.constant 0 : i32
    %c0_i32_0 = arith.constant 0 : i32
    return %c0_i32, %arg0 : i32, i32
  }
  func.func @transform_3(%arg0: i32, %arg1: i32) -> (i32, i32) {
    %c0_i32 = arith.constant 0 : i32
    %c0_i32_0 = arith.constant 0 : i32
    return %arg1, %c0_i32 : i32, i32
  }
  func.func @transform_4(%arg0: i32, %arg1: i32) -> (i32, i32) {
    %c0_i32 = arith.constant 0 : i32
    return %arg1, %arg0 : i32, i32
  }
}

</mosaic_0001>

<bundles_post_ra>
// kernel: tpu_custom_call.1
= control target key start
LH: loop header
LB: loop body
LE: loop exit
PB: predicated region body
PF: predicated region fallthrough
CT: control target
= control target key end

     0   :  { %9 = vsyncpa [#allocation3], 0  ;;  %s465_s0 = inlined_call_operand.vmem [shape: f32[8,32], index: 0, kind: input, shape index: {}]   ;;  %s466_s1 = inlined_call_operand.hbm [shape: bf16[32,512], index: 1, kind: input, shape index: {}]   ;;  %s467_s2 = inlined_call_operand.hbm [shape: f32[1,512], index: 2, kind: input, shape index: {}]   ;;  %s468_s3 = inlined_call_operand.vmem [shape: s32[8,1], index: 3, kind: input, shape index: {}]   ;;  %s469_s4 = inlined_call_operand.hbm [shape: f32[8,512], index: 4, kind: output, shape index: {}]  }
   0x1   :  { %10 = vsyncpa [#allocation6], 0 }
   0x2   :  { %11 = vsyncpa [#allocation4], 0  ;;  %s18_s17 = sshll.u32 %s466_s1, 4  ;;  %s407_s18 = smov [#allocation2]   ;;  %s19_s17 = int_to_ptr.hbm [resolvable:$true] %s18_s17 }
   0x3   :  { %s20_s19 = sshll.u32 %s407_s18, 4  ;;  %s32_s22 = sshll.u32 %s467_s2, 4  ;;  %s21_s19 = int_to_ptr.vmem [resolvable:$true] %s20_s19  ;;  %s33_s22 = int_to_ptr.hbm [resolvable:$true] %s32_s22 }
   0x4   :  { %s408_s23 = smov 256   ;;  %s409_s24 = smov 16  }
   0x5   :  { %26 = dma.hbm_to_vmem [thread:$0]  %s19_s17, 1024, %s21_s19, [#allocation3], %s408_s23, %s408_s23, %s409_s24  }
   0x6   :  { %s410_s25 = smov [#allocation5]  }
   0x7   :  { %s34_s26 = sshll.u32 %s410_s25, 4  ;;  %s35_s26 = int_to_ptr.vmem [resolvable:$true] %s34_s26 }
   0x8   :  { %37 = dma.hbm_to_vmem [thread:$0]  %s33_s22, 64, %s35_s26, [#allocation6]  }
   0x9   :  { %401 = dma.done.wait [#allocation3], 1024  }
   0xa   :  { %402 = vsyncadd [#allocation3], 4294966272 }
   0xb   :  { %403 = dma.done.wait [#allocation6], 64  }
   0xc   :  { %404 = vsyncadd [#allocation6], 4294967232  ;;  %v411_v0 = vmov 0   ;;  %v284_v1 = vld [vmem:[#allocation2 + $0x20] sm:$0xf]  ;;  %vm53_vm0 = vcmask 261120   ;;  %v196_v34 = vlaneseq }
   0xd   :  { %326 = vset.pattern.permute.xlu1 %v411_v0  ;;  %325 = vset.pattern.permute.xlu0 %v411_v0  ;;  %v316_v2 = vld [vmem:[#allocation2 + $0x2c] sm:$0xf0]  ;;  %v314_v3 = vld [vmem:[#allocation2 + $0x24] sm:$0xf]  ;;  %v286_v5 = vld [vmem:[#allocation2 + $0x30] sm:$0xf0] }
   0xe   :  { %v285_v4 = vor.u32 %v316_v2, %v284_v1  ;;  %v292_v6 = vld [vmem:[#allocation2 + $0x28] sm:$0xf]  ;;  %v317_v7 = vld [vmem:[#allocation2 + $0x34] sm:$0xf0]  ;;  %v289_v8 = vor.u32 %v314_v3, %v286_v5  ;;  %v315_v10 = vld [vmem:[#allocation2 + $0x2c] sm:$0xf] }
   0xf   :  { %v293_v9 = vor.u32 %v317_v7, %v292_v6  ;;  %v294_v11 = vld [vmem:[#allocation2 + $0x38] sm:$0xf0]  ;;  %v49_v12 = vld [vmem:[%s465_s0] sm:$0xff]  ;;  %v312_v16 = vld [vmem:[#allocation2 + $0xc] sm:$0xf0]  ;;  %v197_v37 = vand.u32 127, %v196_v34 }
  0x10   :  { %125 = vmatpush.bf16.msra.mxu0 %v285_v4  ;;  %v297_v13 = vor.u32 %v315_v10, %v294_v11  ;;  %v52_v14 = vmul.f32 %v49_v12, %v49_v12  ;;  %v268_v15 = vld [vmem:[#allocation2] sm:$0xf]  ;;  %v310_v17 = vld [vmem:[#allocation2 + $0x4] sm:$0xf]  ;;  %138 = vmatpush.bf16.msra.mxu1 %v289_v8  ;;  %v270_v19 = vld [vmem:[#allocation2 + $0x10] sm:$0xf0]  ;;  %v67_v28 = vpack.c.bf16 %v49_v12, %v49_v12 }
  0x11   :  { %151 = vmatpush.bf16.msra.mxu2 %v293_v9  ;;  %v269_v18 = vor.u32 %v312_v16, %v268_v15  ;;  %v276_v20 = vld [vmem:[#allocation2 + $0x8] sm:$0xf]  ;;  %v313_v21 = vld [vmem:[#allocation2 + $0x14] sm:$0xf0]  ;;  %v273_v23 = vor.u32 %v310_v17, %v270_v19  ;;  %v311_v25 = vld [vmem:[#allocation2 + $0xc] sm:$0xf] }
  0x12   :  { %164 = vmatpush.bf16.msra.mxu3 %v297_v13  ;;  %v54_v22 = vsel %vm53_vm0, %v52_v14, 0.0  ;;  %v277_v24 = vor.u32 %v313_v21, %v276_v20  ;;  %v278_v26 = vld [vmem:[#allocation2 + $0x18] sm:$0xf0]  ;;  %v50_v27 = vld [vmem:[%s468_s3] sm:$0xff]  ;;  %v198_v44 = vadd.s32 128, %v197_v37  ;;  %v199_v45 = vadd.s32 256, %v197_v37 }
  0x13   :  { %55 = vadd.xlane.f32.xlu0 %v54_v22  ;;  %v281_v29 = vor.u32 %v311_v25, %v278_v26  ;;  %vm214_vm1 = vcmp.ne.s32.totalorder %v50_v27, 4294967295  ;;  %v51_v39 = vld [vmem:[#allocation5] sm:$0xf]  ;;  %v200_v48 = vadd.s32 384, %v197_v37  ;;  %v412_v57 = vmov 0.0   ;;  %s413_s3 = smov [#allocation7]  }
  0x14   :  { %126 = vmatpush.bf16.msra.mxu0 %v269_v18  ;;  %v215_v30 = vsel %vm214_vm1, 1, %v411_v0  ;;  %139 = vmatpush.bf16.msra.mxu1 %v273_v23  ;;  %v176_v46 = vperm.slane %v51_v39, 0  ;;  %v177_v47 = vperm.slane %v51_v39, 1  ;;  %v178_v53 = vperm.slane %v51_v39, 2  ;;  %s253_s28 = sshll.u32 %s413_s3, 4  ;;  %s255_s5 = sshll.u32 %s469_s4, 4  ;;  %s254_s28 = int_to_ptr.vmem [resolvable:$true] %s253_s28  ;;  %s256_s5 = int_to_ptr.hbm [resolvable:$true] %s255_s5 }
  0x15   :  { %152 = vmatpush.bf16.msra.mxu2 %v277_v24  ;;  %217 = vperm.xlu1 %326, %v215_v30   ;;  %v179_v61 = vperm.slane %v51_v39, 3 }
  0x16   :  { %165 = vmatpush.bf16.msra.mxu3 %v281_v29 }
  0x17   :  { %298 = vmatmul.msk.bf16.vlgmr.msra.gmra.mxu0 %vm53_vm0, %v67_v28  ;;  %299 = vmatmul.msk.bf16.vlgmr.msra.gmra.mxu1 %vm53_vm0, %v67_v28 }
  0x18   :  { %300 = vmatmul.msk.bf16.vlgmr.msra.gmra.mxu2 %vm53_vm0, %v67_v28 }
  0x19   :  { %301 = vmatmul.msk.bf16.vlgmr.msra.gmra.mxu3 %vm53_vm0, %v67_v28 }
  0x27   :  { %208 = vperm.xlu0 %325, %v50_v27  }
  0x86   :  { %v56_v31 = vpop.xlane.xlu0 %55 }
  0x87   :  { %327 = vrsqrt.f32 %v56_v31  ;;  %v218_v42 = vpop.permute.xlu1 %217  ;;  %vm63_vm3 = vweird.f32 %v56_v31 }
  0x88   :  { %vm219_vm5 = vcmp.eq.s32.totalorder %v218_v42, 1 }
  0x8d   :  { %v328_v32 = vpop.eup %327 }
  0x8e   :  { %v58_v33 = vmul.f32 %v328_v32, %v56_v31  ;;  %vm64_vm2 = vweird.f32 %v328_v32 }
  0x8f   :  { %vm65_vm4 = vmor %vm63_vm3, %vm64_vm2 }
  0x90   :  { %v59_v35 = vmul.f32 %v328_v32, %v58_v33 }
  0x92   :  { %v60_v36 = vmul.f32 0.5, %v59_v35 }
  0x94   :  { %v61_v38 = vsub.f32 1.5, %v60_v36  ;;  %v128_v40 = vpop.f32.mrf.mxu0  ;;  %v141_v41 = vpop.f32.mrf.mxu1 }
  0x96   :  { %v62_v43 = vmul.f32 %v328_v32, %v61_v38 }
  0x98   :  { %v66_v49 = vsel %vm65_vm4, %v328_v32, %v62_v43 }
  0x99   :  { %v171_v50 = vmul.f32 %v128_v40, %v66_v49  ;;  %v172_v51 = vmul.f32 %v141_v41, %v66_v49  ;;  %v209_v52 = vpop.permute.xlu0 %208 }
  0x9a   :  { %vm210_vm6 = vcmp.eq.s32.totalorder %v197_v37, %v209_v52  ;;  %vm211_vm7 = vcmp.eq.s32.totalorder %v198_v44, %v209_v52  ;;  %vm212_vm8 = vcmp.eq.s32.totalorder %v199_v45, %v209_v52  ;;  %vm213_vm9 = vcmp.eq.s32.totalorder %v200_v48, %v209_v52 }
  0x9b   :  { %v184_v54 = vmul.f32 %v176_v46, %v171_v50  ;;  %v185_v55 = vmul.f32 %v177_v47, %v172_v51  ;;  %vm220_vm10 = vmand %vm210_vm6, %vm219_vm5  ;;  %v154_v56 = vpop.f32.mrf.mxu2 }
  0x9c   :  { %vm221_vm11 = vmand %vm211_vm7, %vm219_vm5  ;;  %v306_v58 = vsel %vm220_vm10, 1.0, %v412_v57  ;;  %v173_v59 = vmul.f32 %v154_v56, %v66_v49  ;;  %v167_v60 = vpop.f32.mrf.mxu3  ;;  %v130_v62 = vpop.f32.mrf.mxu0 }
  0x9d   :  { %v302_v63 = vclamps-f32 %v184_v54, 1.0  ;;  %v303_v0 = vclamps-f32 %v185_v55, 1.0  ;;  %vm222_vm12 = vmand %vm212_vm8, %vm219_vm5  ;;  %v307_v1 = vsel %vm221_vm11, 1.0, %v412_v57  ;;  %v232_v2 = vmul.f32 0.35, %v306_v58  ;;  %v143_v3 = vpop.f32.mrf.mxu1 }
  0x9e   :  { %vm223_vm13 = vmand %vm213_vm9, %vm219_vm5  ;;  %v308_v4 = vsel %vm222_vm12, 1.0, %v412_v57  ;;  %v233_v5 = vmul.f32 0.35, %v307_v1  ;;  %v186_v6 = vmul.f32 %v178_v53, %v173_v59  ;;  %v174_v7 = vmul.f32 %v167_v60, %v66_v49 }
  0x9f   :  { %v309_v8 = vsel %vm223_vm13, 1.0, %v412_v57  ;;  %v234_v9 = vmul.f32 0.35, %v308_v4  ;;  %v236_v10 = vsub.f32 %v302_v63, %v232_v2 }
  0xa0   :  { %v235_v11 = vmul.f32 0.35, %v309_v8  ;;  %v237_v12 = vsub.f32 %v303_v0, %v233_v5  ;;  %v304_v13 = vclamps-f32 %v186_v6, 1.0  ;;  %v187_v14 = vmul.f32 %v179_v61, %v174_v7 }
  0xa1   :  { %v240_v15 = vmul.f32 64.0, %v236_v10 }
  0xa2   :  { %v241_v16 = vmul.f32 64.0, %v237_v12  ;;  %v238_v17 = vsub.f32 %v304_v13, %v234_v9  ;;  %v305_v18 = vclamps-f32 %v187_v14, 1.0 }
  0xa3   :  { %244 = vst [vmem:[#allocation7] sm:$0xff] %v240_v15  ;;  %v156_v19 = vpop.f32.mrf.mxu2 }
  0xa4   :  { %245 = vst [vmem:[#allocation7 + $0x8] sm:$0xff] %v241_v16  ;;  %v242_v20 = vmul.f32 64.0, %v238_v17  ;;  %v239_v21 = vsub.f32 %v305_v18, %v235_v11  ;;  %v169_v22 = vpop.f32.mrf.mxu3 }
  0xa6   :  { %246 = vst [vmem:[#allocation7 + $0x10] sm:$0xff] %v242_v20  ;;  %v243_v23 = vmul.f32 64.0, %v239_v21 }
  0xa8   :  { %247 = vst [vmem:[#allocation7 + $0x18] sm:$0xff] %v243_v23 }
  0xa9   :  { %258 = dma.vmem_to_hbm [thread:$0]  %s254_s28, 512, %s256_s5, [#allocation4]  }
  0xaa   :  { %405 = dma.done.wait [#allocation4], 512  }
  0xab   :  { %406 = vsyncadd [#allocation4], 4294966784 }
  0xac   :  { %263 = vsyncpa [#allocation3], 1 }
  0xad   :  { %264 = vsyncpa [#allocation6], 1 }
  0xae   :  { %265 = vsyncpa [#allocation4], 1 }

</bundles_post_ra>
